<compile_context>
chip_gen: v7x
topology: tpu7x:2x2x1
jax: 0.10.0
libtpu: 0.0.40
codegen_flags: <defaults>
</compile_context>

<pallas_src>
import jax
import jax.numpy as jnp
from jax.experimental import pallas as pl
from jax.experimental.pallas import tpu as pltpu

LANE = 128


def _round_up(n, m):
    return ((n + m - 1) // m) * m


def _block_diag(w, p, rows, cols):
    """Place p copies of w along the diagonal of a zero (rows, cols) matrix."""
    r, c = w.shape
    out = jnp.zeros((rows, cols), w.dtype)
    for j in range(p):
        out = out.at[j * r:(j + 1) * r, j * c:(j + 1) * c].set(w)
    return out


def _tile_cols(b, p, cols):
    """Place p copies of the (1, n) bias side by side in a zero (1, cols) row."""
    n = b.shape[1]
    out = jnp.zeros((1, cols), b.dtype)
    for j in range(p):
        out = out.at[:, j * n:(j + 1) * n].set(b)
    return out


def prepare_params(params, *, use_bf16=True):
    """One-time parameter prep (hoisted out of the forward pass).

    If 128 % H == 0, pack = 128 // H batch rows share one 128-lane vector row
    (block-diagonal weights); otherwise pack = 1 and the hidden dim is simply
    zero-padded to a multiple of 128 lanes.  MXU-layer weights are stored in
    bf16 (f32 accumulation in the kernel); layer-1 weights and all biases stay
    f32.  Zero padding / off-diagonal blocks are exactly zero, so packing never
    leaks between batch rows.
    """
    H = params["w1"].shape[1]
    pack = LANE // H if (H <= LANE and LANE % H == 0) else 1
    HL = _round_up(H * pack, LANE)
    mm_dtype = jnp.bfloat16 if use_bf16 else jnp.float32
    f32 = jnp.float32

    return dict(
        pack=pack,
        w1=_block_diag(params["w1"], pack, 2 * pack, HL).astype(f32),
        b1=_tile_cols(params["b1"], pack, HL).astype(f32),
        w2=_block_diag(params["w2"], pack, HL, HL).astype(mm_dtype),
        b2=_tile_cols(params["b2"], pack, HL).astype(f32),
        w3=_block_diag(params["w3"], pack, HL, HL).astype(mm_dtype),
        b3=_tile_cols(params["b3"], pack, HL).astype(f32),
        w4=_block_diag(params["w4"], pack, HL, 2 * pack).astype(mm_dtype),
        b4=_tile_cols(params["b4"], pack, 2 * pack).astype(f32),
    )


def generator_toy_kernel(x_ref, w1_ref, b1_ref, w2_ref, b2_ref,
                         w3_ref, b3_ref, w4_ref, b4_ref, o_ref):
    """One batch tile of the fused 4-layer MLP; all weights resident in VMEM."""
    x = x_ref[...]                      # [tile_rows, 2*pack]  f32
    w1 = w1_ref[...]                    # [2*pack, HL]         f32

    # Layer 1 (K = 2*pack <= 8): VPU outer product instead of pushing a
    # nearly-empty operand through the MXU.  f32 (v5e VPU has no bf16).
    h = x[:, 0:1] * w1[0:1, :] + b1_ref[...]
    for j in range(1, w1_ref.shape[0]):
        h = h + x[:, j:j + 1] * w1[j:j + 1, :]
    h = jnp.maximum(h, 0.0)

    # Layers 2/3: HL x HL (block-diagonal) MXU matmuls, bf16 operands with
    # f32 accumulation; bias add + ReLU in f32.
    h = jnp.dot(h.astype(w2_ref.dtype), w2_ref[...],
                preferred_element_type=jnp.float32) + b2_ref[...]
    h = jnp.maximum(h, 0.0)

    h = jnp.dot(h.astype(w3_ref.dtype), w3_ref[...],
                preferred_element_type=jnp.float32) + b3_ref[...]
    h = jnp.maximum(h, 0.0)

    # Layer 4: narrow (2*pack lane) output -> no HBM writeback amplification.
    out = jnp.dot(h.astype(w4_ref.dtype), w4_ref[...],
                  preferred_element_type=jnp.float32) + b4_ref[...]
    o_ref[...] = out.astype(o_ref.dtype)


def generator_toy_forward(x, prepped, *, max_tile_batch=4096):
    """x: [B, 2] float32. prepped: output of prepare_params()."""
    B, in_dim = x.shape
    assert in_dim == 2
    p = prepped["pack"]
    cols = 2 * p

    # Pad the batch only to the packing granularity (8 sublanes * pack rows),
    # NOT to a multiple of the tile; the grid uses cdiv, so the last tile may
    # overhang (overhanging rows never reach HBM on writeback).
    B_pad = _round_up(B, 8 * p)
    if B_pad != B:
        x = jnp.pad(x, ((0, B_pad - B), (0, 0)))
    rows = B_pad // p
    xp = x.reshape(rows, cols)          # free row-major reshape: p rows per vector row

    # Tile: large enough to amortize the ~0.35us per-step pipeline overhead;
    # single step for small batches, >=2 steps for large ones (v7x megacore).
    # VMEM at the cap: resident weights ~0.1 MB + double-buffered x/out tiles
    # ~0.3 MB -> far under every generation's scoped limit.
    tile_rows = min(max(_round_up(max_tile_batch, 8 * p) // p, 8), rows)
    grid = (pl.cdiv(rows, tile_rows),)

    const = lambda i: (0, 0)            # weights/biases: single resident block
    batch_spec = pl.BlockSpec((tile_rows, cols), lambda i: (i, 0))

    out = pl.pallas_call(
        generator_toy_kernel,
        out_shape=jax.ShapeDtypeStruct((rows, cols), jnp.float32),
        grid=grid,
        in_specs=[
            batch_spec,                                   # x (batch-tiled)
            pl.BlockSpec(prepped["w1"].shape, const),     # w1
            pl.BlockSpec(prepped["b1"].shape, const),     # b1
            pl.BlockSpec(prepped["w2"].shape, const),     # w2
            pl.BlockSpec(prepped["b2"].shape, const),     # b2
            pl.BlockSpec(prepped["w3"].shape, const),     # w3
            pl.BlockSpec(prepped["b3"].shape, const),     # b3
            pl.BlockSpec(prepped["w4"].shape, const),     # w4
            pl.BlockSpec(prepped["b4"].shape, const),     # b4
        ],
        out_specs=batch_spec,
        compiler_params=pltpu.CompilerParams(
            dimension_semantics=("parallel",)),
    )(xp, prepped["w1"], prepped["b1"], prepped["w2"], prepped["b2"],
      prepped["w3"], prepped["b3"], prepped["w4"], prepped["b4"])

    return out.reshape(B_pad, 2)[:B]


def init_params(key, hidden_dim):
    """PyTorch nn.Linear-style init (uniform +-1/sqrt(fan_in)).

    Weights stored pre-transposed as [in_features, out_features]; biases as
    [1, out_features].
    """
    dims = [(2, hidden_dim), (hidden_dim, hidden_dim),
            (hidden_dim, hidden_dim), (hidden_dim, 2)]
    params = {}
    keys = jax.random.split(key, 2 * len(dims))
    for i, (fan_in, fan_out) in enumerate(dims):
        bound = 1.0 / jnp.sqrt(jnp.asarray(fan_in, jnp.float32))
        w = jax.random.uniform(keys[2 * i], (fan_in, fan_out),
                               minval=-bound, maxval=bound, dtype=jnp.float32)
        b = jax.random.uniform(keys[2 * i + 1], (1, fan_out),
                               minval=-bound, maxval=bound, dtype=jnp.float32)
        params[f"w{i + 1}"] = w
        params[f"b{i + 1}"] = b
    return params


def reference_forward(x, params):
    """Pure-JAX f32 reference (highest matmul precision)."""
    hp = jax.lax.Precision.HIGHEST
    h = jnp.maximum(jnp.dot(x, params["w1"], precision=hp) + params["b1"], 0.0)
    h = jnp.maximum(jnp.dot(h, params["w2"], precision=hp) + params["b2"], 0.0)
    h = jnp.maximum(jnp.dot(h, params["w3"], precision=hp) + params["b3"], 0.0)
    return jnp.dot(h, params["w4"], precision=hp) + params["b4"]


if __name__ == "__main__":
    key = jax.random.PRNGKey(0)
    k_param, k_x = jax.random.split(key)

    hidden_dim = 32
    params = init_params(k_param, hidden_dim)

    # One-time parameter prep (packing + bf16 cast), reused across all calls.
    prepped = prepare_params(params, use_bf16=True)

    # Small batch: single tile, exercises the packed (4 rows / vector row) path.
    x_small = jax.random.normal(k_x, (8, 2), dtype=jnp.float32)
    out_small = jax.block_until_ready(generator_toy_forward(x_small, prepped))
    ref_small = reference_forward(x_small, params)
    assert out_small.shape == (8, 2), out_small.shape
    assert jnp.allclose(out_small, ref_small, atol=5e-2, rtol=5e-2), \
        "mismatch vs reference (small batch)"

    # Mid batch not a multiple of the packing group: still a single grid step.
    x_mid = jax.random.normal(jax.random.PRNGKey(1), (1030, 2), dtype=jnp.float32)
    out_mid = jax.block_until_ready(generator_toy_forward(x_mid, prepped))
    ref_mid = reference_forward(x_mid, params)
    assert out_mid.shape == (1030, 2), out_mid.shape
    assert jnp.allclose(out_mid, ref_mid, atol=5e-2, rtol=5e-2), \
        "mismatch vs reference (mid batch)"

    # Large batch: multi-step cdiv grid with an overhanging last tile.
    x_big = jax.random.normal(jax.random.PRNGKey(2), (10000, 2), dtype=jnp.float32)
    out_big = jax.block_until_ready(generator_toy_forward(x_big, prepped))
    ref_big = reference_forward(x_big, params)
    assert out_big.shape == (10000, 2), out_big.shape
    assert jnp.allclose(out_big, ref_big, atol=5e-2, rtol=5e-2), \
        "mismatch vs reference (large batch, multi-tile grid)"

    print("KERNEL_OK")
</pallas_src>

<mosaic_0001>
module attributes {stable_mosaic.version = 11 : i64} {
  func.func @generator_toy_kernel(%arg0: i32, %arg1: memref<8x8xf32, #tpu.memory_space<vmem>>, %arg2: memref<8x128xf32, #tpu.memory_space<vmem>>, %arg3: memref<1x128xf32, #tpu.memory_space<vmem>>, %arg4: memref<128x128xbf16, #tpu.memory_space<vmem>>, %arg5: memref<1x128xf32, #tpu.memory_space<vmem>>, %arg6: memref<128x128xbf16, #tpu.memory_space<vmem>>, %arg7: memref<1x128xf32, #tpu.memory_space<vmem>>, %arg8: memref<128x8xbf16, #tpu.memory_space<vmem>>, %arg9: memref<1x8xf32, #tpu.memory_space<vmem>>, %arg10: memref<8x8xf32, #tpu.memory_space<vmem>>) attributes {dimension_semantics = [#tpu.dimension_semantics<parallel>], iteration_bounds = array<i64: 1>, scalar_prefetch = 0 : i64, scratch_operands = 0 : i64, tpu.core_type = #tpu.core_type<tc>, window_params = [{transform_indices = @transform_0, window_bounds = array<i64: 8, 8>}, {pipeline_mode = #tpu.pipeline_mode<synchronous>, transform_indices = @transform_1, window_bounds = array<i64: 8, 128>}, {pipeline_mode = #tpu.pipeline_mode<synchronous>, transform_indices = @transform_2, window_bounds = array<i64: 1, 128>}, {pipeline_mode = #tpu.pipeline_mode<synchronous>, transform_indices = @transform_3, window_bounds = array<i64: 128, 128>}, {pipeline_mode = #tpu.pipeline_mode<synchronous>, transform_indices = @transform_4, window_bounds = array<i64: 1, 128>}, {pipeline_mode = #tpu.pipeline_mode<synchronous>, transform_indices = @transform_5, window_bounds = array<i64: 128, 128>}, {pipeline_mode = #tpu.pipeline_mode<synchronous>, transform_indices = @transform_6, window_bounds = array<i64: 1, 128>}, {pipeline_mode = #tpu.pipeline_mode<synchronous>, transform_indices = @transform_7, window_bounds = array<i64: 128, 8>}, {pipeline_mode = #tpu.pipeline_mode<synchronous>, transform_indices = @transform_8, window_bounds = array<i64: 1, 8>}, {transform_indices = @transform_9, window_bounds = array<i64: 8, 8>}]} {
    %c0 = arith.constant 0 : index
    %c0_0 = arith.constant 0 : index
    %0 = vector.load %arg1[%c0, %c0_0] : memref<8x8xf32, #tpu.memory_space<vmem>>, vector<8x8xf32>
    %c0_1 = arith.constant 0 : index
    %c0_2 = arith.constant 0 : index
    %1 = vector.load %arg2[%c0_1, %c0_2] : memref<8x128xf32, #tpu.memory_space<vmem>>, vector<8x128xf32>
    %2 = vector.extract_strided_slice %0 {offsets = [0, 0], sizes = [8, 1], strides = [1, 1]} : vector<8x8xf32> to vector<8x1xf32>
    %3 = vector.extract_strided_slice %1 {offsets = [0, 0], sizes = [1, 128], strides = [1, 1]} : vector<8x128xf32> to vector<1x128xf32>
    %4 = vector.broadcast %2 : vector<8x1xf32> to vector<8x128xf32>
    %5 = vector.broadcast %3 : vector<1x128xf32> to vector<8x128xf32>
    %6 = arith.mulf %4, %5 : vector<8x128xf32>
    %c0_3 = arith.constant 0 : index
    %c0_4 = arith.constant 0 : index
    %7 = vector.load %arg3[%c0_3, %c0_4] : memref<1x128xf32, #tpu.memory_space<vmem>>, vector<1x128xf32>
    %8 = vector.broadcast %7 : vector<1x128xf32> to vector<8x128xf32>
    %9 = arith.addf %6, %8 : vector<8x128xf32>
    %10 = vector.extract_strided_slice %0 {offsets = [0, 1], sizes = [8, 1], strides = [1, 1]} : vector<8x8xf32> to vector<8x1xf32>
    %11 = vector.extract_strided_slice %1 {offsets = [1, 0], sizes = [1, 128], strides = [1, 1]} : vector<8x128xf32> to vector<1x128xf32>
    %12 = vector.broadcast %10 : vector<8x1xf32> to vector<8x128xf32>
    %13 = vector.broadcast %11 : vector<1x128xf32> to vector<8x128xf32>
    %14 = arith.mulf %12, %13 : vector<8x128xf32>
    %15 = arith.addf %9, %14 : vector<8x128xf32>
    %16 = vector.extract_strided_slice %0 {offsets = [0, 2], sizes = [8, 1], strides = [1, 1]} : vector<8x8xf32> to vector<8x1xf32>
    %17 = vector.extract_strided_slice %1 {offsets = [2, 0], sizes = [1, 128], strides = [1, 1]} : vector<8x128xf32> to vector<1x128xf32>
    %18 = vector.broadcast %16 : vector<8x1xf32> to vector<8x128xf32>
    %19 = vector.broadcast %17 : vector<1x128xf32> to vector<8x128xf32>
    %20 = arith.mulf %18, %19 : vector<8x128xf32>
    %21 = arith.addf %15, %20 : vector<8x128xf32>
    %22 = vector.extract_strided_slice %0 {offsets = [0, 3], sizes = [8, 1], strides = [1, 1]} : vector<8x8xf32> to vector<8x1xf32>
    %23 = vector.extract_strided_slice %1 {offsets = [3, 0], sizes = [1, 128], strides = [1, 1]} : vector<8x128xf32> to vector<1x128xf32>
    %24 = vector.broadcast %22 : vector<8x1xf32> to vector<8x128xf32>
    %25 = vector.broadcast %23 : vector<1x128xf32> to vector<8x128xf32>
    %26 = arith.mulf %24, %25 : vector<8x128xf32>
    %27 = arith.addf %21, %26 : vector<8x128xf32>
    %28 = vector.extract_strided_slice %0 {offsets = [0, 4], sizes = [8, 1], strides = [1, 1]} : vector<8x8xf32> to vector<8x1xf32>
    %29 = vector.extract_strided_slice %1 {offsets = [4, 0], sizes = [1, 128], strides = [1, 1]} : vector<8x128xf32> to vector<1x128xf32>
    %30 = vector.broadcast %28 : vector<8x1xf32> to vector<8x128xf32>
    %31 = vector.broadcast %29 : vector<1x128xf32> to vector<8x128xf32>
    %32 = arith.mulf %30, %31 : vector<8x128xf32>
    %33 = arith.addf %27, %32 : vector<8x128xf32>
    %34 = vector.extract_strided_slice %0 {offsets = [0, 5], sizes = [8, 1], strides = [1, 1]} : vector<8x8xf32> to vector<8x1xf32>
    %35 = vector.extract_strided_slice %1 {offsets = [5, 0], sizes = [1, 128], strides = [1, 1]} : vector<8x128xf32> to vector<1x128xf32>
    %36 = vector.broadcast %34 : vector<8x1xf32> to vector<8x128xf32>
    %37 = vector.broadcast %35 : vector<1x128xf32> to vector<8x128xf32>
    %38 = arith.mulf %36, %37 : vector<8x128xf32>
    %39 = arith.addf %33, %38 : vector<8x128xf32>
    %40 = vector.extract_strided_slice %0 {offsets = [0, 6], sizes = [8, 1], strides = [1, 1]} : vector<8x8xf32> to vector<8x1xf32>
    %41 = vector.extract_strided_slice %1 {offsets = [6, 0], sizes = [1, 128], strides = [1, 1]} : vector<8x128xf32> to vector<1x128xf32>
    %42 = vector.broadcast %40 : vector<8x1xf32> to vector<8x128xf32>
    %43 = vector.broadcast %41 : vector<1x128xf32> to vector<8x128xf32>
    %44 = arith.mulf %42, %43 : vector<8x128xf32>
    %45 = arith.addf %39, %44 : vector<8x128xf32>
    %46 = vector.extract_strided_slice %0 {offsets = [0, 7], sizes = [8, 1], strides = [1, 1]} : vector<8x8xf32> to vector<8x1xf32>
    %47 = vector.extract_strided_slice %1 {offsets = [7, 0], sizes = [1, 128], strides = [1, 1]} : vector<8x128xf32> to vector<1x128xf32>
    %48 = vector.broadcast %46 : vector<8x1xf32> to vector<8x128xf32>
    %49 = vector.broadcast %47 : vector<1x128xf32> to vector<8x128xf32>
    %50 = arith.mulf %48, %49 : vector<8x128xf32>
    %51 = arith.addf %45, %50 : vector<8x128xf32>
    %cst = arith.constant 0.000000e+00 : f32
    %52 = vector.broadcast %cst : f32 to vector<8x128xf32>
    %53 = arith.maximumf %51, %52 : vector<8x128xf32>
    %54 = arith.truncf %53 : vector<8x128xf32> to vector<8x128xbf16>
    %c0_5 = arith.constant 0 : index
    %c0_6 = arith.constant 0 : index
    %55 = vector.load %arg4[%c0_5, %c0_6] : memref<128x128xbf16, #tpu.memory_space<vmem>>, vector<128x128xbf16>
    %cst_7 = arith.constant dense<0.000000e+00> : vector<8x128xf32>
    %56 = tpu.matmul %54, %55, %cst_7 {dimension_numbers = #tpu.dot_dimension_numbers<[1], [0], [0], [1], [0, 0, 1, 1], [], []>} : vector<8x128xbf16>, vector<128x128xbf16>, vector<8x128xf32> -> vector<8x128xf32>
    %c0_8 = arith.constant 0 : index
    %c0_9 = arith.constant 0 : index
    %57 = vector.load %arg5[%c0_8, %c0_9] : memref<1x128xf32, #tpu.memory_space<vmem>>, vector<1x128xf32>
    %58 = vector.broadcast %57 : vector<1x128xf32> to vector<8x128xf32>
    %59 = arith.addf %56, %58 : vector<8x128xf32>
    %cst_10 = arith.constant 0.000000e+00 : f32
    %60 = vector.broadcast %cst_10 : f32 to vector<8x128xf32>
    %61 = arith.maximumf %59, %60 : vector<8x128xf32>
    %62 = arith.truncf %61 : vector<8x128xf32> to vector<8x128xbf16>
    %c0_11 = arith.constant 0 : index
    %c0_12 = arith.constant 0 : index
    %63 = vector.load %arg6[%c0_11, %c0_12] : memref<128x128xbf16, #tpu.memory_space<vmem>>, vector<128x128xbf16>
    %cst_13 = arith.constant dense<0.000000e+00> : vector<8x128xf32>
    %64 = tpu.matmul %62, %63, %cst_13 {dimension_numbers = #tpu.dot_dimension_numbers<[1], [0], [0], [1], [0, 0, 1, 1], [], []>} : vector<8x128xbf16>, vector<128x128xbf16>, vector<8x128xf32> -> vector<8x128xf32>
    %c0_14 = arith.constant 0 : index
    %c0_15 = arith.constant 0 : index
    %65 = vector.load %arg7[%c0_14, %c0_15] : memref<1x128xf32, #tpu.memory_space<vmem>>, vector<1x128xf32>
    %66 = vector.broadcast %65 : vector<1x128xf32> to vector<8x128xf32>
    %67 = arith.addf %64, %66 : vector<8x128xf32>
    %cst_16 = arith.constant 0.000000e+00 : f32
    %68 = vector.broadcast %cst_16 : f32 to vector<8x128xf32>
    %69 = arith.maximumf %67, %68 : vector<8x128xf32>
    %70 = arith.truncf %69 : vector<8x128xf32> to vector<8x128xbf16>
    %c0_17 = arith.constant 0 : index
    %c0_18 = arith.constant 0 : index
    %71 = vector.load %arg8[%c0_17, %c0_18] : memref<128x8xbf16, #tpu.memory_space<vmem>>, vector<128x8xbf16>
    %cst_19 = arith.constant dense<0.000000e+00> : vector<8x8xf32>
    %72 = tpu.matmul %70, %71, %cst_19 {dimension_numbers = #tpu.dot_dimension_numbers<[1], [0], [0], [1], [0, 0, 1, 1], [], []>} : vector<8x128xbf16>, vector<128x8xbf16>, vector<8x8xf32> -> vector<8x8xf32>
    %c0_20 = arith.constant 0 : index
    %c0_21 = arith.constant 0 : index
    %73 = vector.load %arg9[%c0_20, %c0_21] : memref<1x8xf32, #tpu.memory_space<vmem>>, vector<1x8xf32>
    %74 = vector.broadcast %73 : vector<1x8xf32> to vector<8x8xf32>
    %75 = arith.addf %72, %74 : vector<8x8xf32>
    %c0_22 = arith.constant 0 : index
    %c0_23 = arith.constant 0 : index
    %76 = vector.load %arg10[%c0_22, %c0_23] : memref<8x8xf32, #tpu.memory_space<vmem>>, vector<8x8xf32>
    tpu.vector_store %arg10[%c0_22, %c0_23], %75 {strides = array<i32>} : memref<8x8xf32, #tpu.memory_space<vmem>>, vector<8x8xf32>,
    return
  }
  func.func @transform_0(%arg0: i32) -> (i32, i32) {
    %c0_i32 = arith.constant 0 : i32
    %c0_i32_0 = arith.constant 0 : i32
    return %arg0, %c0_i32 : i32, i32
  }
  func.func @transform_1(%arg0: i32) -> (i32, i32) {
    %c0_i32 = arith.constant 0 : i32
    %c0_i32_0 = arith.constant 0 : i32
    %c0_i32_1 = arith.constant 0 : i32
    return %c0_i32, %c0_i32_0 : i32, i32
  }
  func.func @transform_2(%arg0: i32) -> (i32, i32) {
    %c0_i32 = arith.constant 0 : i32
    %c0_i32_0 = arith.constant 0 : i32
    %c0_i32_1 = arith.constant 0 : i32
    return %c0_i32, %c0_i32_0 : i32, i32
  }
  func.func @transform_3(%arg0: i32) -> (i32, i32) {
    %c0_i32 = arith.constant 0 : i32
    %c0_i32_0 = arith.constant 0 : i32
    %c0_i32_1 = arith.constant 0 : i32
    return %c0_i32, %c0_i32_0 : i32, i32
  }
  func.func @transform_4(%arg0: i32) -> (i32, i32) {
    %c0_i32 = arith.constant 0 : i32
    %c0_i32_0 = arith.constant 0 : i32
    %c0_i32_1 = arith.constant 0 : i32
    return %c0_i32, %c0_i32_0 : i32, i32
  }
  func.func @transform_5(%arg0: i32) -> (i32, i32) {
    %c0_i32 = arith.constant 0 : i32
    %c0_i32_0 = arith.constant 0 : i32
    %c0_i32_1 = arith.constant 0 : i32
    return %c0_i32, %c0_i32_0 : i32, i32
  }
  func.func @transform_6(%arg0: i32) -> (i32, i32) {
    %c0_i32 = arith.constant 0 : i32
    %c0_i32_0 = arith.constant 0 : i32
    %c0_i32_1 = arith.constant 0 : i32
    return %c0_i32, %c0_i32_0 : i32, i32
  }
  func.func @transform_7(%arg0: i32) -> (i32, i32) {
    %c0_i32 = arith.constant 0 : i32
    %c0_i32_0 = arith.constant 0 : i32
    %c0_i32_1 = arith.constant 0 : i32
    return %c0_i32, %c0_i32_0 : i32, i32
  }
  func.func @transform_8(%arg0: i32) -> (i32, i32) {
    %c0_i32 = arith.constant 0 : i32
    %c0_i32_0 = arith.constant 0 : i32
    %c0_i32_1 = arith.constant 0 : i32
    return %c0_i32, %c0_i32_0 : i32, i32
  }
  func.func @transform_9(%arg0: i32) -> (i32, i32) {
    %c0_i32 = arith.constant 0 : i32
    %c0_i32_0 = arith.constant 0 : i32
    return %arg0, %c0_i32 : i32, i32
  }
}

</mosaic_0001>

<bundles_post_ra>
// kernel: tpu_custom_call.1
= control target key start
LH: loop header
LB: loop body
LE: loop exit
PB: predicated region body
PF: predicated region fallthrough
CT: control target
= control target key end

     0   :  { %14 = vsyncpa [#allocation3], 0  ;;  %s943_s0 = inlined_call_operand.vmem [shape: f32[8,8], index: 0, kind: input, shape index: {}]   ;;  %s944_s1 = inlined_call_operand.hbm [shape: f32[8,128], index: 1, kind: input, shape index: {}]   ;;  %s945_s2 = inlined_call_operand.vmem [shape: f32[1,128], index: 2, kind: input, shape index: {}]   ;;  %s946_s3 = inlined_call_operand.vmem [shape: bf16[128,128], index: 3, kind: input, shape index: {}]   ;;  %s947_s4 = inlined_call_operand.vmem [shape: f32[1,128], index: 4, kind: input, shape index: {}]   ;;  %s948_s5 = inlined_call_operand.hbm [shape: bf16[128,128], index: 5, kind: input, shape index: {}]   ;;  %s949_s6 = inlined_call_operand.vmem [shape: f32[1,128], index: 6, kind: input, shape index: {}]   ;;  %s950_s7 = inlined_call_operand.vmem [shape: bf16[128,8], index: 7, kind: input, shape index: {}]   ;;  %s951_s8 = inlined_call_operand.vmem [shape: f32[1,8], index: 8, kind: input, shape index: {}]   ;;  %s952_s9 = inlined_call_operand.hbm [shape: f32[8,8], index: 9, kind: output, shape index: {}]  }
   0x1   :  { %15 = vsyncpa [#allocation6], 0 }
   0x2   :  { %16 = vsyncpa [#allocation4], 0  ;;  %s742_s30 = smov [#allocation2]   ;;  %s743_s11 = smov [#allocation5]  }
   0x3   :  { %s25_s10 = sshll.u32 %s742_s30, 4  ;;  %s40_s12 = sshll.u32 %s743_s11, 4  ;;  %s26_s10 = int_to_ptr.vmem [resolvable:$true] %s25_s10  ;;  %s807_s12 = int_to_ptr.vmem [resolvable:$true] %s40_s12 }
   0x4   :  { %s670_s15 = scalar_lea.hbm %s944_s1, 128 }
   0x5   :  { %p671_p0 = scmp.ne.s32.totalorder %s944_s1, %s670_s15  ;;  %p674_p1 = scmp.lt.u32.totalorder %s670_s15, %s944_s1 }
   0x7   :  { %p676_p2 = pnand %p674_p1, %p671_p0 }
   0x9   :  { %679 = shalt.err (!%p676_p2)
}
   0xa   :  { %s680_s20 = scalar_lea.vmem %s26_s10, 128  ;;  %p685_p4 = scmp.lt.s32.totalorder %s26_s10, %s26_s10 }
   0xb   :  { %p681_p3 = scmp.ne.s32.totalorder %s26_s10, %s680_s20  ;;  %p686_p5 = scmp.lt.s32.totalorder %s680_s20, %s680_s20 }
   0xd   :  { %p687_p6 = por %p686_p5, %p685_p4 }
   0xf   :  { %p688_p7 = pnand %p687_p6, %p681_p3 }
  0x11   :  { %691 = shalt.err (!%p688_p7)
}
  0x12   :  { %28 = dma.hbm_to_vmem [thread:$0]  %s944_s1, 128, %s26_s10, [#allocation3]  }
  0x13   :  { %s692_s25 = scalar_lea.hbm %s948_s5, 1024 }
  0x14   :  { %p693_p8 = scmp.ne.s32.totalorder %s948_s5, %s692_s25  ;;  %p696_p9 = scmp.lt.u32.totalorder %s692_s25, %s948_s5 }
  0x16   :  { %p698_p10 = pnand %p696_p9, %p693_p8 }
  0x18   :  { %701 = shalt.err (!%p698_p10)
}
  0x19   :  { %s702_s30 = scalar_lea.vmem %s807_s12, 1024  ;;  %p707_p12 = scmp.lt.s32.totalorder %s807_s12, %s807_s12 }
  0x1a   :  { %p703_p11 = scmp.ne.s32.totalorder %s807_s12, %s702_s30  ;;  %p708_p13 = scmp.lt.s32.totalorder %s702_s30, %s702_s30 }
  0x1c   :  { %p709_p0 = por %p708_p13, %p707_p12 }
  0x1e   :  { %p710_p1 = pnand %p709_p0, %p703_p11 }
  0x20   :  { %713 = shalt.err (!%p710_p1)
}
  0x21   :  { %s744_s1 = smov 64   ;;  %s745_s10 = smov 4  }
  0x22   :  { %46 = dma.hbm_to_vmem [thread:$0]  %s948_s5, 1024, %s807_s12, [#allocation6], %s744_s1, %s744_s1, %s745_s10  }
  0x23   :  { %736 = dma.done.wait [#allocation3], 128  }
  0x24   :  { %737 = vsyncadd [#allocation3], 4294967168 }
  0x25   :  { %738 = dma.done.wait [#allocation6], 1024  }
  0x26   :  { %739 = vsyncadd [#allocation6], 4294966272  ;;  %v746_v0 = vmov 2   ;;  %v747_v1 = vmov 0   ;;  %v748_v2 = vmov 0.0   ;;  %v60_v3 = vld [vmem:[%s943_s0] sm:$0xff]  ;;  %v67_v24 = vlaneseq }
  0x27   :  { %639 = vset.pattern.permute.xlu1 %v746_v0  ;;  %637 = vset.pattern.permute.xlu0 %v747_v1  ;;  %v646_v4 = vld [vmem:[%s946_s3] sm:$0xff]   ;;  %v647_v5 = vld [vmem:[%s946_s3 + $0x8] sm:$0xff]   ;;  %v749_v6 = vmov 3   ;;  %v750_v7 = vmov 1   ;;  %v648_v8 = vld [vmem:[%s946_s3 + $0x10] sm:$0xff]   ;;  %v751_v9 = vmov 4  }
  0x28   :  { %562 = vmatprep.subr.bf16.mxu0 %v748_v2  ;;  %582 = vmatprep.subr.bf16.mxu1 %v748_v2  ;;  %v752_v10 = vmov 5   ;;  %v649_v11 = vld [vmem:[%s946_s3 + $0x18] sm:$0xff]   ;;  %v753_v12 = vmov 6   ;;  %v754_v13 = vmov 7   ;;  %v650_v14 = vld [vmem:[%s946_s3 + $0x20] sm:$0xff]   ;;  %v651_v15 = vld [vmem:[%s946_s3 + $0x28] sm:$0xff]  }
  0x29   :  { %91 = vperm.xlu1 %639, %v60_v3   ;;  %64 = vperm.xlu0 %637, %v60_v3   ;;  %v652_v16 = vld [vmem:[%s946_s3 + $0x30] sm:$0xff]   ;;  %v653_v17 = vld [vmem:[%s946_s3 + $0x38] sm:$0xff]   ;;  %vm755_vm0 = vmmov 0   ;;  %v654_v18 = vld [vmem:[#allocation5] sm:$0xff]   ;;  %v68_v25 = vshrl.u32 %v67_v24, 7  ;;  %s756_s26 = smov [#allocation7]  }
  0x2a   :  { %563 = vmatpush3.bf16.msra.mxu0 %v646_v4  ;;  %578 = vmatprep.mubr.msk.bf16.mxu0 %vm755_vm0, %v748_v2  ;;  %v655_v19 = vld [vmem:[#allocation5 + $0x8] sm:$0xff]   ;;  %v656_v20 = vld [vmem:[#allocation5 + $0x10] sm:$0xff]   ;;  %v657_v21 = vld [vmem:[#allocation5 + $0x18] sm:$0xff]   ;;  %s497_s27 = sshll.u32 %s756_s26, 4  ;;  %vm489_vm1 = vcmask 64512   ;;  %s498_s27 = int_to_ptr.vmem [resolvable:$true] %s497_s27 }
  0x2b   :  { %564 = vmatprep.subr.bf16.mxu0 %v748_v2  ;;  %598 = vmatprep.mubr.msk.bf16.mxu1 %vm755_vm0, %v748_v2  ;;  %v658_v22 = vld [vmem:[#allocation5 + $0x20] sm:$0xff]   ;;  %v659_v23 = vld [vmem:[#allocation5 + $0x28] sm:$0xff]   ;;  %v69_v26 = vsub.s32 0, %v68_v25  ;;  %v61_v27 = vld [vmem:[#allocation2] sm:$0xff]  ;;  %v86_v29 = vsub.s32 1, %v68_v25  ;;  %v96_v30 = vsub.s32 2, %v68_v25  ;;  %p719_p3 = scmp.lt.s32.totalorder %s498_s27, %s498_s27 }
  0x2c   :  { %583 = vmatpush3.bf16.msra.mxu1 %v654_v18  ;;  %v507_v33 = vld [vmem:[%s945_s2] ss:$0 sm:$0xff]  ;;  %v106_v35 = vsub.s32 3, %v68_v25  ;;  %v116_v37 = vsub.s32 4, %v68_v25  ;;  %v126_v42 = vsub.s32 5, %v68_v25  ;;  %v136_v49 = vsub.s32 6, %v68_v25 }
  0x2d   :  { %640 = vset.pattern.permute.xlu1 %v749_v6  ;;  %638 = vset.pattern.permute.xlu0 %v750_v7  ;;  %v70_v28 = vrot.slane %v61_v27, %v69_v26  ;;  %v87_v36 = vrot.slane %v61_v27, %v86_v29  ;;  %v97_v38 = vrot.slane %v61_v27, %v96_v30  ;;  %v146_v58 = vsub.s32 7, %v68_v25  ;;  %v660_v7 = vld [vmem:[#allocation5 + $0x30] sm:$0xff]   ;;  %v517_v25 = vld [vmem:[%s949_s6] ss:$0 sm:$0xff]  ;;  %s714_s6 = scalar_lea.vmem %s498_s27, 128 }
  0x2e   :  { %101 = vperm.xlu1 %640, %v60_v3   ;;  %81 = vperm.xlu0 %638, %v60_v3   ;;  %v107_v43 = vrot.slane %v61_v27, %v106_v35  ;;  %v117_v45 = vrot.slane %v61_v27, %v116_v37  ;;  %v127_v48 = vrot.slane %v61_v27, %v126_v42  ;;  %v669_v24 = vld [vmem:[%s950_s7 + $0x38] sm:$0xff]   ;;  %p715_p2 = scmp.ne.s32.totalorder %s498_s27, %s714_s6  ;;  %p720_p4 = scmp.lt.s32.totalorder %s714_s6, %s714_s6 }
  0x2f   :  { %565 = vmatpush3.bf16.msra.mxu0 %v647_v5  ;;  %584 = vmatprep.subr.bf16.mxu1 %v748_v2  ;;  %v137_v57 = vrot.slane %v61_v27, %v136_v49  ;;  %v147_v63 = vrot.slane %v61_v27, %v146_v58 }
  0x30   :  { %566 = vmatprep.subr.bf16.mxu0 %v748_v2  ;;  %585 = vmatpush3.bf16.msra.mxu1 %v655_v19  ;;  %p721_p5 = por %p720_p4, %p719_p3 }
  0x31   :  { %586 = vmatprep.subr.bf16.mxu1 %v748_v2 }
  0x32   :  { %641 = vset.pattern.permute.xlu1 %v751_v9  ;;  %642 = vset.pattern.permute.xlu0 %v752_v10  ;;  %v662_v9 = vld [vmem:[%s950_s7] sm:$0xff]   ;;  %v663_v10 = vld [vmem:[%s950_s7 + $0x8] sm:$0xff]   ;;  %p722_p6 = pnand %p721_p5, %p715_p2 }
  0x33   :  { %111 = vperm.xlu1 %641, %v60_v3   ;;  %121 = vperm.xlu0 %642, %v60_v3  }
  0x34   :  { %567 = vmatpush3.bf16.msra.mxu0 %v648_v8  ;;  %587 = vmatpush3.bf16.msra.mxu1 %v656_v20  ;;  %v661_v8 = vld [vmem:[#allocation5 + $0x38] sm:$0xff]  }
  0x35   :  { %568 = vmatprep.subr.bf16.mxu0 %v748_v2  ;;  %588 = vmatprep.subr.bf16.mxu1 %v748_v2 }
  0x37   :  { %643 = vset.pattern.permute.xlu1 %v753_v12  ;;  %645 = vset.pattern.permute.xlu0 %v754_v13  ;;  %v665_v12 = vld [vmem:[%s950_s7 + $0x18] sm:$0xff]  }
  0x38   :  { %131 = vperm.xlu1 %643, %v60_v3   ;;  %569 = vmatpush3.bf16.msra.mxu0 %v649_v11  ;;  %v664_v11 = vld [vmem:[%s950_s7 + $0x10] sm:$0xff]  }
  0x39   :  { %570 = vmatprep.subr.bf16.mxu0 %v748_v2  ;;  %589 = vmatpush3.bf16.msra.mxu1 %v657_v21 }
  0x3a   :  { %590 = vmatprep.subr.bf16.mxu1 %v748_v2 }
  0x3c   :  { %644 = vset.pattern.permute.xlu1 %v754_v13  ;;  %571 = vmatpush3.bf16.msra.mxu0 %v650_v14  ;;  %v666_v13 = vld [vmem:[%s950_s7 + $0x20] sm:$0xff]   ;;  %v667_v14 = vld [vmem:[%s950_s7 + $0x28] sm:$0xff]  }
  0x3d   :  { %141 = vperm.xlu1 %644, %v60_v3   ;;  %572 = vmatprep.subr.bf16.mxu0 %v748_v2 }
  0x3e   :  { %591 = vmatpush3.bf16.msra.mxu1 %v658_v22 }
  0x3f   :  { %592 = vmatprep.subr.bf16.mxu1 %v748_v2 }
  0x40   :  { %573 = vmatpush3.bf16.msra.mxu0 %v651_v15  ;;  %v508_v15 = vld [vmem:[%s947_s4] ss:$0 sm:$0xff] }
  0x41   :  { %574 = vmatprep.subr.bf16.mxu0 %v748_v2 }
  0x42   :  { %593 = vmatpush3.bf16.msra.mxu1 %v659_v23  ;;  %v668_v23 = vld [vmem:[%s950_s7 + $0x30] sm:$0xff]  }
  0x43   :  { %594 = vmatprep.subr.bf16.mxu1 %v748_v2 }
  0x44   :  { %575 = vmatpush3.bf16.msra.mxu0 %v652_v16 }
  0x45   :  { %576 = vmatprep.subr.bf16.mxu0 %v748_v2 }
  0x46   :  { %595 = vmatpush3.bf16.msra.mxu1 %v660_v7 }
  0x47   :  { %596 = vmatprep.subr.bf16.mxu1 %v748_v2 }
  0x48   :  { %577 = vmatpush3.bf16.msra.mxu0 %v653_v17 }
  0x49   :  { %602 = vmatprep.subr.bf16.mxu0 %v748_v2 }
  0x4a   :  { %597 = vmatpush3.bf16.msra.mxu1 %v661_v8 }
  0xa8   :  { %v92_v31 = vpop.permute.xlu1 %91  ;;  %v65_v32 = vpop.permute.xlu0 %64 }
  0xa9   :  { %v71_v34 = vmul.f32 %v70_v28, %v65_v32  ;;  %v98_v46 = vmul.f32 %v97_v38, %v92_v31 }
  0xab   :  { %v79_v39 = vadd.f32 %v507_v33, %v71_v34 }
  0xad   :  { %v102_v40 = vpop.permute.xlu1 %101  ;;  %v82_v41 = vpop.permute.xlu0 %81 }
  0xae   :  { %v88_v44 = vmul.f32 %v87_v36, %v82_v41  ;;  %v108_v50 = vmul.f32 %v107_v43, %v102_v40 }
  0xb0   :  { %v89_v47 = vadd.f32 %v88_v44, %v79_v39 }
  0xb2   :  { %v99_v51 = vadd.f32 %v98_v46, %v89_v47  ;;  %v112_v52 = vpop.permute.xlu1 %111  ;;  %v122_v53 = vpop.permute.xlu0 %121 }
  0xb3   :  { %v118_v54 = vmul.f32 %v117_v45, %v112_v52  ;;  %v128_v56 = vmul.f32 %v127_v48, %v122_v53 }
  0xb4   :  { %v109_v55 = vadd.f32 %v108_v50, %v99_v51 }
  0xb6   :  { %v119_v59 = vadd.f32 %v118_v54, %v109_v55 }
  0xb7   :  { %v132_v60 = vpop.permute.xlu1 %131 }
  0xb8   :  { %v129_v61 = vadd.f32 %v128_v56, %v119_v59  ;;  %v138_v62 = vmul.f32 %v137_v57, %v132_v60 }
  0xba   :  { %v139_v1 = vadd.f32 %v138_v62, %v129_v61 }
  0xbc   :  { %v142_v0 = vpop.permute.xlu1 %141 }
  0xbd   :  { %v148_v3 = vmul.f32 %v147_v63, %v142_v0 }
  0xbf   :  { %v149_v4 = vadd.f32 %v148_v3, %v139_v1 }
  0xc1   :  { %v150_v5 = vmax.f32 %v149_v4, 0.0 }
  0xc3   :  { %v151_v6 = vpack.c.bf16 %v150_v5, %v150_v5 }
  0xc5   :  { %579 = vmatmul.mubr.bf16.vlgmr.msra.gmra.mrb[0].mxu0 %v151_v6 }
  0xc6   :  { %618 = vmatprep.mubr.msk.bf16.mxu0 %vm755_vm0, %v748_v2  ;;  %603 = vmatpush3.bf16.msra.mxu0 %v662_v9 }
  0xc7   :  { %604 = vmatprep.subr.bf16.mxu0 %v748_v2 }
  0xca   :  { %605 = vmatpush3.bf16.msra.mxu0 %v663_v10 }
  0xcb   :  { %606 = vmatprep.subr.bf16.mxu0 %v748_v2 }
  0xce   :  { %607 = vmatpush3.bf16.msra.mxu0 %v664_v11 }
  0xcf   :  { %608 = vmatprep.subr.bf16.mxu0 %v748_v2 }
  0xd2   :  { %609 = vmatpush3.bf16.msra.mxu0 %v665_v12 }
  0xd3   :  { %610 = vmatprep.subr.bf16.mxu0 %v748_v2 }
  0xd6   :  { %611 = vmatpush3.bf16.msra.mxu0 %v666_v13 }
  0xd7   :  { %612 = vmatprep.subr.bf16.mxu0 %v748_v2 }
  0xda   :  { %613 = vmatpush3.bf16.msra.mxu0 %v667_v14 }
  0xdb   :  { %614 = vmatprep.subr.bf16.mxu0 %v748_v2 }
  0xde   :  { %615 = vmatpush3.bf16.msra.mxu0 %v668_v23 }
  0xdf   :  { %616 = vmatprep.subr.bf16.mxu0 %v748_v2  ;;  %v526_v2 = vld [vmem:[%s951_s8] ss:$0 sm:$0xff] }
  0xe2   :  { %617 = vmatpush3.bf16.msra.mxu0 %v669_v24 }
 0x198   :  { %v257_v16 = vpop.f32.mrb[0].mxu0 }
 0x199   :  { %v258_v17 = vadd.f32 %v508_v15, %v257_v16  ;;  %v580_v18 = vpop.f32.mrb[1].mxu0 }
 0x19a   :  { %v260_v19 = vpop.f32.mrb[2].mxu0 }
 0x19b   :  { %v263_v20 = vmax.f32 %v258_v17, 0.0  ;;  %v581_v21 = vpop.f32.mrb[3].mxu0 }
 0x19d   :  { %v264_v22 = vpack.c.bf16 %v263_v20, %v263_v20 }
 0x19f   :  { %599 = vmatmul.mubr.bf16.vlgmr.msra.gmra.mrb[0].mxu1 %v264_v22 }
 0x272   :  { %v370_v26 = vpop.f32.mrb[0].mxu1 }
 0x273   :  { %v371_v27 = vadd.f32 %v517_v25, %v370_v26  ;;  %v600_v28 = vpop.f32.mrb[1].mxu1 }
 0x274   :  { %v373_v29 = vpop.f32.mrb[2].mxu1 }
 0x275   :  { %v376_v30 = vmax.f32 %v371_v27, 0.0  ;;  %v601_v31 = vpop.f32.mrb[3].mxu1 }
 0x277   :  { %v377_v32 = vpack.c.bf16 %v376_v30, %v376_v30 }
 0x279   :  { %619 = vmatmul.mubr.bf16.vlgmr.msra.gmra.mrb[4].mxu0 %v377_v32 }
 0x34c   :  { %v483_v33 = vpop.f32.mrb[4].mxu0 }
 0x34d   :  { %v484_v34 = vadd.f32 %v526_v2, %v483_v33  ;;  %v620_v35 = vpop.f32.mrb[5].mxu0 }
 0x34e   :  { %v486_v36 = vpop.f32.mrb[6].mxu0 }
 0x34f   :  { %v621_v37 = vpop.f32.mrb[7].mxu0  ;;  %490 = vst.msk [vmem:[#allocation7] sm:$0xff] %vm489_vm1, %v484_v34 }
 0x350   :  { %725 = shalt.err (!%p722_p6)
}
 0x351   :  { %s726_s8 = scalar_lea.hbm %s952_s9, 128 }
 0x352   :  { %p727_p7 = scmp.ne.s32.totalorder %s952_s9, %s726_s8  ;;  %p730_p8 = scmp.lt.u32.totalorder %s726_s8, %s952_s9 }
 0x354   :  { %p732_p9 = pnand %p730_p8, %p727_p7 }
 0x356   :  { %735 = shalt.err (!%p732_p9)
}
 0x357   :  { %500 = dma.vmem_to_hbm [thread:$0]  %s498_s27, 128, %s952_s9, [#allocation4]  }
 0x358   :  { %740 = dma.done.wait [#allocation4], 128  }
 0x359   :  { %741 = vsyncadd [#allocation4], 4294967168 }
 0x35a   :  { %504 = vsyncpa [#allocation3], 1 }
 0x35b   :  { %505 = vsyncpa [#allocation6], 1 }
 0x35c   :  { %506 = vsyncpa [#allocation4], 1 }

</bundles_post_ra>
